<compile_context>
chip_gen: v5e
topology: v5e:2x2
jax: 0.10.0
libtpu: 0.0.40
codegen_flags: <defaults>
</compile_context>

<pallas_src>
import jax
import jax.numpy as jnp
from jax.experimental import pallas as pl
from jax.experimental.pallas import tpu as pltpu


def _standardize_kernel(x_ref, mean_ref, inv_ref, o_ref):
    # x_ref:    (TM, D) tile of input
    # mean_ref: (1, D)  per-feature mean, float32 (same block every grid step -> VMEM resident)
    # inv_ref:  (1, D)  precomputed 1 / (stddev + eps), float32
    # o_ref:    (TM, D) output tile
    x = x_ref[...].astype(jnp.float32)
    o_ref[...] = ((x - mean_ref[...]) * inv_ref[...]).astype(o_ref.dtype)


def standardize(x, mean, stddev, eps=1e-9, *, max_tile_bytes=4 << 20):
    """y = (x - mean) / (stddev + eps), per-feature broadcast over the last dim."""
    orig_shape = x.shape
    D = orig_shape[-1]
    x2 = x.reshape(-1, D)
    N = x2.shape[0]

    # Precompute broadcast vectors once, in float32 so eps=1e-9 survives bf16 inputs.
    mean32 = mean.astype(jnp.float32).reshape(1, D)
    inv32 = (1.0 / (stddev.astype(jnp.float32) + jnp.float32(eps))).reshape(1, D)

    # Pick the largest row tile that keeps the x tile <= max_tile_bytes, rounded to the
    # sublane granularity of the dtype (8 for 4-byte, 16 for 2-byte, 32 for 1-byte).
    itemsize = jnp.dtype(x2.dtype).itemsize
    sublane = {4: 8, 2: 16, 1: 32}.get(itemsize, 8)
    row_bytes = max(D * itemsize, 1)
    tile_m = max(sublane, (max_tile_bytes // row_bytes) // sublane * sublane)
    if tile_m >= N:
        tile_m = N  # block equals the full row dim -> always a legal BlockSpec
    grid = (pl.cdiv(N, tile_m),)

    # VMEM budget: double-buffered input + output tiles, plus the (1, D) vectors,
    # plus headroom. Cap at 48 MiB so it also fits v7x's 64 MiB physical VMEM.
    tile_bytes = tile_m * D * itemsize
    vmem_limit = int(4 * tile_bytes + 4 * D * 4 + (4 << 20))
    vmem_limit = max(16 << 20, min(vmem_limit, 48 << 20))

    out = pl.pallas_call(
        _standardize_kernel,
        out_shape=jax.ShapeDtypeStruct((N, D), x2.dtype),
        grid_spec=pltpu.PrefetchScalarGridSpec(
            num_scalar_prefetch=0,
            grid=grid,
            in_specs=[
                pl.BlockSpec((tile_m, D), lambda i: (i, 0)),
                pl.BlockSpec((1, D), lambda i: (0, 0)),
                pl.BlockSpec((1, D), lambda i: (0, 0)),
            ],
            out_specs=pl.BlockSpec((tile_m, D), lambda i: (i, 0)),
        ),
        compiler_params=pltpu.CompilerParams(
            dimension_semantics=("parallel",),
            vmem_limit_bytes=vmem_limit,
        ),
    )(x2, mean32, inv32)
    return out.reshape(orig_shape)


if __name__ == "__main__":
    key = jax.random.PRNGKey(0)
    kx, km, ks, kx2 = jax.random.split(key, 4)

    eps = 1e-9
    D = 128  # lane-dense feature dim

    # Case 1: small, even shape (single large block path).
    N = 256
    x = jax.random.normal(kx, (N, D), dtype=jnp.float32) * 3.0 + 1.5
    mean = jax.random.normal(km, (D,), dtype=jnp.float32)
    stddev = jax.random.uniform(ks, (D,), dtype=jnp.float32, minval=0.5, maxval=2.0)

    y = standardize(x, mean, stddev, eps)
    jax.block_until_ready(y)
    y_ref = (x - mean[None, :]) / (stddev[None, :] + eps)
    assert jnp.allclose(y, y_ref, atol=1e-5, rtol=1e-5), "mismatch vs reference (even N)"

    # Case 2: ragged row count + tiny forced tile (exercises cdiv grid + padded last block).
    N2 = 52
    xr = jax.random.normal(kx2, (N2, D), dtype=jnp.float32) * 2.0 - 0.7
    y2 = standardize(xr, mean, stddev, eps, max_tile_bytes=8 * D * 4)  # tile_m = 8
    jax.block_until_ready(y2)
    y2_ref = (xr - mean[None, :]) / (stddev[None, :] + eps)
    assert jnp.allclose(y2, y2_ref, atol=1e-5, rtol=1e-5), "mismatch vs reference (ragged N)"

    print("KERNEL_OK")
</pallas_src>

<mosaic_0001>
module attributes {stable_mosaic.version = 11 : i64} {
  func.func @_standardize_kernel(%arg0: i32, %arg1: memref<256x128xf32, #tpu.memory_space<vmem>>, %arg2: memref<1x128xf32, #tpu.memory_space<vmem>>, %arg3: memref<1x128xf32, #tpu.memory_space<vmem>>, %arg4: memref<256x128xf32, #tpu.memory_space<vmem>>) attributes {dimension_semantics = [#tpu.dimension_semantics<parallel>], iteration_bounds = array<i64: 1>, scalar_prefetch = 0 : i64, scratch_operands = 0 : i64, tpu.core_type = #tpu.core_type<tc>, window_params = [{transform_indices = @transform_0, window_bounds = array<i64: 256, 128>}, {pipeline_mode = #tpu.pipeline_mode<synchronous>, transform_indices = @transform_1, window_bounds = array<i64: 1, 128>}, {pipeline_mode = #tpu.pipeline_mode<synchronous>, transform_indices = @transform_2, window_bounds = array<i64: 1, 128>}, {transform_indices = @transform_3, window_bounds = array<i64: 256, 128>}]} {
    %c0 = arith.constant 0 : index
    %c0_0 = arith.constant 0 : index
    %0 = vector.load %arg1[%c0, %c0_0] : memref<256x128xf32, #tpu.memory_space<vmem>>, vector<256x128xf32>
    %c0_1 = arith.constant 0 : index
    %c0_2 = arith.constant 0 : index
    %1 = vector.load %arg2[%c0_1, %c0_2] : memref<1x128xf32, #tpu.memory_space<vmem>>, vector<1x128xf32>
    %2 = vector.broadcast %1 : vector<1x128xf32> to vector<256x128xf32>
    %3 = arith.subf %0, %2 : vector<256x128xf32>
    %c0_3 = arith.constant 0 : index
    %c0_4 = arith.constant 0 : index
    %4 = vector.load %arg3[%c0_3, %c0_4] : memref<1x128xf32, #tpu.memory_space<vmem>>, vector<1x128xf32>
    %5 = vector.broadcast %4 : vector<1x128xf32> to vector<256x128xf32>
    %6 = arith.mulf %3, %5 : vector<256x128xf32>
    %c0_5 = arith.constant 0 : index
    %c0_6 = arith.constant 0 : index
    %7 = vector.load %arg4[%c0_5, %c0_6] : memref<256x128xf32, #tpu.memory_space<vmem>>, vector<256x128xf32>
    tpu.vector_store %arg4[%c0_5, %c0_6], %6 {strides = array<i32>} : memref<256x128xf32, #tpu.memory_space<vmem>>, vector<256x128xf32>,
    return
  }
  func.func @transform_0(%arg0: i32) -> (i32, i32) {
    %c0_i32 = arith.constant 0 : i32
    %c0_i32_0 = arith.constant 0 : i32
    return %arg0, %c0_i32 : i32, i32
  }
  func.func @transform_1(%arg0: i32) -> (i32, i32) {
    %c0_i32 = arith.constant 0 : i32
    %c0_i32_0 = arith.constant 0 : i32
    %c0_i32_1 = arith.constant 0 : i32
    return %c0_i32, %c0_i32_0 : i32, i32
  }
  func.func @transform_2(%arg0: i32) -> (i32, i32) {
    %c0_i32 = arith.constant 0 : i32
    %c0_i32_0 = arith.constant 0 : i32
    %c0_i32_1 = arith.constant 0 : i32
    return %c0_i32, %c0_i32_0 : i32, i32
  }
  func.func @transform_3(%arg0: i32) -> (i32, i32) {
    %c0_i32 = arith.constant 0 : i32
    %c0_i32_0 = arith.constant 0 : i32
    return %arg0, %c0_i32 : i32, i32
  }
}

</mosaic_0001>

<bundles_post_ra>
// kernel: tpu_custom_call.1
= control target key start
LH: loop header
LB: loop body
LE: loop exit
PB: predicated region body
PF: predicated region fallthrough
CT: control target
= control target key end

     0   :  { %8 = vsyncpa [#allocation3], 0  ;;  %s397_s0 = inlined_call_operand.hbm [shape: f32[256,128], index: 0, kind: input, shape index: {}]   ;;  %s398_s1 = inlined_call_operand.hbm [shape: f32[1,128], index: 1, kind: input, shape index: {}]   ;;  %s399_s2 = inlined_call_operand.vmem [shape: f32[1,128], index: 2, kind: input, shape index: {}]   ;;  %s400_s3 = inlined_call_operand.hbm [shape: f32[256,128], index: 3, kind: output, shape index: {}]  }
   0x1   :  { %9 = vsyncpa [#allocation6], 0 }
   0x2   :  { %10 = vsyncpa [#allocation4], 0  ;;  %s15_s14 = sshll.u32 %s397_s0, 4  ;;  %s286_s15 = smov [#allocation2]   ;;  %s16_s14 = int_to_ptr.hbm [resolvable:$true] %s15_s14 }
   0x3   :  { %s17_s16 = sshll.u32 %s286_s15, 4  ;;  %s29_s19 = sshll.u32 %s398_s1, 4  ;;  %s18_s16 = int_to_ptr.vmem [resolvable:$true] %s17_s16  ;;  %s30_s19 = int_to_ptr.hbm [resolvable:$true] %s29_s19 }
   0x4   :  { %s287_s20 = smov 128   ;;  %s288_s21 = smov 8  }
   0x5   :  { %23 = dma.hbm_to_vmem [thread:$0]  %s16_s14, 4096, %s18_s16, [#allocation3], %s287_s20, %s287_s20, %s288_s21  }
   0x6   :  { %s289_s22 = smov [#allocation5]  }
   0x7   :  { %s31_s23 = sshll.u32 %s289_s22, 4  ;;  %s32_s23 = int_to_ptr.vmem [resolvable:$true] %s31_s23 }
   0x8   :  { %34 = dma.hbm_to_vmem [thread:$0]  %s30_s19, 16, %s32_s23, [#allocation6]  }
   0x9   :  { %280 = dma.done.wait [#allocation3], 4096  }
   0xa   :  { %281 = vsyncadd [#allocation3], 4294963200 }
   0xb   :  { %282 = dma.done.wait [#allocation6], 16  }
   0xc   :  { %283 = vsyncadd [#allocation6], 4294967280  ;;  %v45_v0 = vld [vmem:[#allocation2] sm:$0xff]  ;;  %v46_v3 = vld [vmem:[#allocation2 + $0x8] sm:$0xff]  ;;  %s187_s27 = sshll.u32 %s400_s3, 4  ;;  %s188_s27 = int_to_ptr.hbm [resolvable:$true] %s187_s27 }
   0xd   :  { %v320_v1 = vld [vmem:[#allocation5] ss:$0 sm:$0xff]  ;;  %v47_v6 = vld [vmem:[#allocation2 + $0x10] sm:$0xff]  ;;  %v48_v7 = vld [vmem:[#allocation2 + $0x18] sm:$0xff] }
   0xe   :  { %v325_v2 = vld [vmem:[%s399_s2] ss:$0 sm:$0xff]  ;;  %v81_v4 = vsub.f32 %v45_v0, %v320_v1  ;;  %v82_v5 = vsub.f32 %v46_v3, %v320_v1  ;;  %v83_v9 = vsub.f32 %v47_v6, %v320_v1  ;;  %v84_v10 = vsub.f32 %v48_v7, %v320_v1  ;;  %v50_v12 = vld [vmem:[#allocation2 + $0x28] sm:$0xff]  ;;  %v51_v13 = vld [vmem:[#allocation2 + $0x30] sm:$0xff]  ;;  %s290_s2 = smov [#allocation7]  }
   0xf   :  { %v49_v8 = vld [vmem:[#allocation2 + $0x20] sm:$0xff]  ;;  %v52_v14 = vld [vmem:[#allocation2 + $0x38] sm:$0xff]  ;;  %v86_v17 = vsub.f32 %v50_v12, %v320_v1  ;;  %v87_v18 = vsub.f32 %v51_v13, %v320_v1  ;;  %v54_v20 = vld [vmem:[#allocation2 + $0x48] sm:$0xff]  ;;  %s185_s24 = sshll.u32 %s290_s2, 4  ;;  %s186_s24 = int_to_ptr.vmem [resolvable:$true] %s185_s24 }
  0x10   :  { %v85_v11 = vsub.f32 %v49_v8, %v320_v1  ;;  %v117_v15 = vmul.f32 %v325_v2, %v81_v4  ;;  %v118_v16 = vmul.f32 %v325_v2, %v82_v5  ;;  %v53_v19 = vld [vmem:[#allocation2 + $0x40] sm:$0xff]  ;;  %v119_v21 = vmul.f32 %v325_v2, %v83_v9  ;;  %v55_v24 = vld [vmem:[#allocation2 + $0x50] sm:$0xff]  ;;  %v56_v27 = vld [vmem:[#allocation2 + $0x58] sm:$0xff] }
  0x11   :  { %v120_v22 = vmul.f32 %v325_v2, %v84_v10  ;;  %v88_v23 = vsub.f32 %v52_v14, %v320_v1  ;;  %v89_v26 = vsub.f32 %v53_v19, %v320_v1  ;;  %v122_v28 = vmul.f32 %v325_v2, %v86_v17  ;;  %v57_v30 = vld [vmem:[#allocation2 + $0x60] sm:$0xff]  ;;  %v58_v33 = vld [vmem:[#allocation2 + $0x68] sm:$0xff]  ;;  %v59_v36 = vld [vmem:[#allocation2 + $0x70] sm:$0xff] }
  0x12   :  { %149 = vst [vmem:[#allocation7] sm:$0xff] %v117_v15  ;;  %v121_v25 = vmul.f32 %v325_v2, %v85_v11  ;;  %v90_v29 = vsub.f32 %v54_v20, %v320_v1  ;;  %v123_v31 = vmul.f32 %v325_v2, %v87_v18  ;;  %v91_v32 = vsub.f32 %v55_v24, %v320_v1  ;;  %v60_v39 = vld [vmem:[#allocation2 + $0x78] sm:$0xff]  ;;  %v61_v42 = vld [vmem:[#allocation2 + $0x80] sm:$0xff]  ;;  %v62_v45 = vld [vmem:[#allocation2 + $0x88] sm:$0xff] }
  0x13   :  { %150 = vst [vmem:[#allocation7 + $0x8] sm:$0xff] %v118_v16  ;;  %v124_v34 = vmul.f32 %v325_v2, %v88_v23  ;;  %v92_v35 = vsub.f32 %v56_v27, %v320_v1  ;;  %v125_v37 = vmul.f32 %v325_v2, %v89_v26  ;;  %v93_v38 = vsub.f32 %v57_v30, %v320_v1  ;;  %v63_v48 = vld [vmem:[#allocation2 + $0x90] sm:$0xff]  ;;  %v64_v51 = vld [vmem:[#allocation2 + $0x98] sm:$0xff]  ;;  %v65_v54 = vld [vmem:[#allocation2 + $0xa0] sm:$0xff] }
  0x14   :  { %151 = vst [vmem:[#allocation7 + $0x10] sm:$0xff] %v119_v21  ;;  %v126_v40 = vmul.f32 %v325_v2, %v90_v29  ;;  %v94_v41 = vsub.f32 %v58_v33, %v320_v1  ;;  %v127_v43 = vmul.f32 %v325_v2, %v91_v32  ;;  %v95_v44 = vsub.f32 %v59_v36, %v320_v1  ;;  %v66_v57 = vld [vmem:[#allocation2 + $0xa8] sm:$0xff]  ;;  %v67_v60 = vld [vmem:[#allocation2 + $0xb0] sm:$0xff]  ;;  %v68_v63 = vld [vmem:[#allocation2 + $0xb8] sm:$0xff] }
  0x15   :  { %152 = vst [vmem:[#allocation7 + $0x18] sm:$0xff] %v120_v22  ;;  %v128_v46 = vmul.f32 %v325_v2, %v92_v35  ;;  %v96_v47 = vsub.f32 %v60_v39, %v320_v1  ;;  %v129_v49 = vmul.f32 %v325_v2, %v93_v38  ;;  %v97_v50 = vsub.f32 %v61_v42, %v320_v1  ;;  %v69_v4 = vld [vmem:[#allocation2 + $0xc0] sm:$0xff]  ;;  %v70_v7 = vld [vmem:[#allocation2 + $0xc8] sm:$0xff]  ;;  %v71_v10 = vld [vmem:[#allocation2 + $0xd0] sm:$0xff] }
  0x16   :  { %153 = vst [vmem:[#allocation7 + $0x20] sm:$0xff] %v121_v25  ;;  %v130_v52 = vmul.f32 %v325_v2, %v94_v41  ;;  %v98_v53 = vsub.f32 %v62_v45, %v320_v1  ;;  %v131_v55 = vmul.f32 %v325_v2, %v95_v44  ;;  %v99_v56 = vsub.f32 %v63_v48, %v320_v1  ;;  %v72_v13 = vld [vmem:[#allocation2 + $0xd8] sm:$0xff]  ;;  %v73_v16 = vld [vmem:[#allocation2 + $0xe0] sm:$0xff]  ;;  %v74_v19 = vld [vmem:[#allocation2 + $0xe8] sm:$0xff] }
  0x17   :  { %154 = vst [vmem:[#allocation7 + $0x28] sm:$0xff] %v122_v28  ;;  %v132_v58 = vmul.f32 %v325_v2, %v96_v47  ;;  %v100_v59 = vsub.f32 %v64_v51, %v320_v1  ;;  %v133_v61 = vmul.f32 %v325_v2, %v97_v50  ;;  %v101_v62 = vsub.f32 %v65_v54, %v320_v1  ;;  %v75_v22 = vld [vmem:[#allocation2 + $0xf0] sm:$0xff]  ;;  %v76_v25 = vld [vmem:[#allocation2 + $0xf8] sm:$0xff] }
  0x18   :  { %155 = vst [vmem:[#allocation7 + $0x30] sm:$0xff] %v123_v31  ;;  %v134_v0 = vmul.f32 %v325_v2, %v98_v53  ;;  %v102_v3 = vsub.f32 %v66_v57, %v320_v1  ;;  %v135_v5 = vmul.f32 %v325_v2, %v99_v56  ;;  %v103_v6 = vsub.f32 %v67_v60, %v320_v1 }
  0x19   :  { %156 = vst [vmem:[#allocation7 + $0x38] sm:$0xff] %v124_v34  ;;  %v136_v8 = vmul.f32 %v325_v2, %v100_v59  ;;  %v104_v9 = vsub.f32 %v68_v63, %v320_v1  ;;  %v137_v11 = vmul.f32 %v325_v2, %v101_v62  ;;  %v105_v12 = vsub.f32 %v69_v4, %v320_v1 }
  0x1a   :  { %157 = vst [vmem:[#allocation7 + $0x40] sm:$0xff] %v125_v37  ;;  %v138_v14 = vmul.f32 %v325_v2, %v102_v3  ;;  %v106_v15 = vsub.f32 %v70_v7, %v320_v1  ;;  %v139_v17 = vmul.f32 %v325_v2, %v103_v6  ;;  %v107_v18 = vsub.f32 %v71_v10, %v320_v1 }
  0x1b   :  { %158 = vst [vmem:[#allocation7 + $0x48] sm:$0xff] %v126_v40  ;;  %v140_v20 = vmul.f32 %v325_v2, %v104_v9  ;;  %v108_v21 = vsub.f32 %v72_v13, %v320_v1  ;;  %v141_v23 = vmul.f32 %v325_v2, %v105_v12  ;;  %v109_v24 = vsub.f32 %v73_v16, %v320_v1 }
  0x1c   :  { %159 = vst [vmem:[#allocation7 + $0x50] sm:$0xff] %v127_v43  ;;  %v142_v26 = vmul.f32 %v325_v2, %v106_v15  ;;  %v110_v27 = vsub.f32 %v74_v19, %v320_v1  ;;  %v143_v28 = vmul.f32 %v325_v2, %v107_v18  ;;  %v111_v29 = vsub.f32 %v75_v22, %v320_v1 }
  0x1d   :  { %160 = vst [vmem:[#allocation7 + $0x58] sm:$0xff] %v128_v46  ;;  %v144_v30 = vmul.f32 %v325_v2, %v108_v21  ;;  %v112_v31 = vsub.f32 %v76_v25, %v320_v1  ;;  %v145_v32 = vmul.f32 %v325_v2, %v109_v24 }
  0x1e   :  { %161 = vst [vmem:[#allocation7 + $0x60] sm:$0xff] %v129_v49  ;;  %v146_v33 = vmul.f32 %v325_v2, %v110_v27  ;;  %v147_v34 = vmul.f32 %v325_v2, %v111_v29 }
  0x1f   :  { %162 = vst [vmem:[#allocation7 + $0x68] sm:$0xff] %v130_v52  ;;  %v148_v35 = vmul.f32 %v325_v2, %v112_v31 }
  0x20   :  { %163 = vst [vmem:[#allocation7 + $0x70] sm:$0xff] %v131_v55 }
  0x21   :  { %164 = vst [vmem:[#allocation7 + $0x78] sm:$0xff] %v132_v58 }
  0x22   :  { %165 = vst [vmem:[#allocation7 + $0x80] sm:$0xff] %v133_v61 }
  0x23   :  { %166 = vst [vmem:[#allocation7 + $0x88] sm:$0xff] %v134_v0 }
  0x24   :  { %167 = vst [vmem:[#allocation7 + $0x90] sm:$0xff] %v135_v5 }
  0x25   :  { %168 = vst [vmem:[#allocation7 + $0x98] sm:$0xff] %v136_v8 }
  0x26   :  { %169 = vst [vmem:[#allocation7 + $0xa0] sm:$0xff] %v137_v11 }
  0x27   :  { %170 = vst [vmem:[#allocation7 + $0xa8] sm:$0xff] %v138_v14 }
  0x28   :  { %171 = vst [vmem:[#allocation7 + $0xb0] sm:$0xff] %v139_v17 }
  0x29   :  { %172 = vst [vmem:[#allocation7 + $0xb8] sm:$0xff] %v140_v20 }
  0x2a   :  { %173 = vst [vmem:[#allocation7 + $0xc0] sm:$0xff] %v141_v23 }
  0x2b   :  { %174 = vst [vmem:[#allocation7 + $0xc8] sm:$0xff] %v142_v26 }
  0x2c   :  { %175 = vst [vmem:[#allocation7 + $0xd0] sm:$0xff] %v143_v28 }
  0x2d   :  { %176 = vst [vmem:[#allocation7 + $0xd8] sm:$0xff] %v144_v30 }
  0x2e   :  { %177 = vst [vmem:[#allocation7 + $0xe0] sm:$0xff] %v145_v32 }
  0x2f   :  { %178 = vst [vmem:[#allocation7 + $0xe8] sm:$0xff] %v146_v33 }
  0x30   :  { %179 = vst [vmem:[#allocation7 + $0xf0] sm:$0xff] %v147_v34 }
  0x31   :  { %180 = vst [vmem:[#allocation7 + $0xf8] sm:$0xff] %v148_v35 }
  0x32   :  { %193 = dma.vmem_to_hbm [thread:$0]  %s186_s24, 4096, %s188_s27, [#allocation4], %s287_s20, %s287_s20, %s288_s21  }
  0x33   :  { %284 = dma.done.wait [#allocation4], 4096  }
  0x34   :  { %285 = vsyncadd [#allocation4], 4294963200 }
  0x35   :  { %198 = vsyncpa [#allocation3], 1 }
  0x36   :  { %199 = vsyncpa [#allocation6], 1 }
  0x37   :  { %200 = vsyncpa [#allocation4], 1 }

</bundles_post_ra>
